<compile_context>
chip_gen: v5e
topology: v5e:2x2
jax: 0.10.0
libtpu: 0.0.40
codegen_flags: <defaults>
</compile_context>

<pallas_src>
import jax
import jax.numpy as jnp
from jax.experimental import pallas as pl
from jax.experimental.pallas import tpu as pltpu


# ---------------------------------------------------------------------------
# Kernel 1: sequential recurrence.  One grid step == T_CHUNK time steps.
# ---------------------------------------------------------------------------
def _rnn_recurrence_kernel(x_ref, h0_ref, whh_ref, y_ref, h_scratch):
    """x_ref: (T_CHUNK, B, H) pre-projected inputs (W_ih^T gather + fused bias)
       h0_ref: (1, B, H) initial state; whh_ref: (H, H)
       y_ref: (T_CHUNK, B, H) hidden states; h_scratch: (B, H) f32 carry."""
    c = pl.program_id(0)

    @pl.when(c == 0)
    def _():
        h_scratch[...] = h0_ref[0].astype(jnp.float32)

    w_hh = whh_ref[...]                       # hoisted once per chunk
    t_chunk = y_ref.shape[0]                  # static

    # Statically unrolled chunk: h stays in vregs, only the recurrent
    # (B,H)@(H,H) matmul + a VPU add + tanh sit on the serial path.
    h = h_scratch[...]                        # f32 carry
    for i in range(t_chunk):                  # static indices -> aligned slices
        h = jnp.tanh(
            x_ref[i].astype(jnp.float32)
            + jnp.dot(h.astype(w_hh.dtype), w_hh,
                      preferred_element_type=jnp.float32)
        )                                     # tanh / add kept in f32 (v5e EUP)
        y_ref[i] = h.astype(y_ref.dtype)
    h_scratch[...] = h


# ---------------------------------------------------------------------------
# Kernel 2: time-parallel output projection  (S*B, H) @ (H, V) + b_q.
# ---------------------------------------------------------------------------
def _projection_kernel(y_ref, w_ref, b_ref, o_ref):
    o_ref[...] = (
        jnp.dot(y_ref[...].astype(w_ref.dtype), w_ref[...],
                preferred_element_type=jnp.float32)
        + b_ref[...].astype(jnp.float32)
    ).astype(o_ref.dtype)


def _largest_divisor_at_most(n, cap):
    for d in range(min(n, cap), 0, -1):
        if n % d == 0:
            return d
    return 1


def _pick_tile(dim, target):
    """Use `target` if it divides dim (aligned tile), else the full dim
    (always legal via the 'block equals full array dim' exception)."""
    return target if (dim % target == 0 and dim >= target) else dim


def rnn_model_forward(inputs, state, params, vocab_size, *,
                      compute_dtype=jnp.float32, time_chunk=8):
    """
    inputs: (batch, seq) int32 token ids
    state:  (1, batch, hidden) float32 initial hidden state
    params: PyTorch-shaped weights:
        W_ih (H, V), W_hh (H, H), b_ih (H,), b_hh (H,)   -- nn.RNN
        W_hq (V, H), b_q (V,)                            -- nn.Linear
    compute_dtype: dtype of matmul operands (use jnp.bfloat16 on v6e/v7x;
                   accumulation / tanh / hidden carry stay f32).
    returns (output (seq*batch, vocab), state (1, batch, hidden))
    """
    B, S = inputs.shape
    H = params["W_hh"].shape[0]
    V = vocab_size

    # --- glue (XLA): embedding gather replaces one_hot + X @ W_ih^T,
    #     with both RNN biases folded in once. ---------------------------------
    w_xh_t = params["W_ih"].T.astype(jnp.float32)                  # (V, H)
    b_h = (params["b_ih"] + params["b_hh"]).astype(jnp.float32)    # (H,)
    tokens = inputs.T.astype(jnp.int32)                            # (S, B)
    x_proj = (w_xh_t[tokens] + b_h).astype(compute_dtype)          # (S, B, H)

    w_hh = params["W_hh"].T.astype(compute_dtype)                  # (H, H)
    h0 = state.astype(jnp.float32)                                 # (1, B, H)

    # --- Pallas 1: sequential recurrence over chunked time grid --------------
    tc = _largest_divisor_at_most(S, time_chunk)
    # NOTE: for large B on v7x, add a leading "parallel" batch grid axis
    # (per-core h scratch) to light up the second TensorCore.
    y = pl.pallas_call(
        _rnn_recurrence_kernel,
        out_shape=jax.ShapeDtypeStruct((S, B, H), jnp.float32),
        grid_spec=pltpu.PrefetchScalarGridSpec(
            num_scalar_prefetch=0,
            grid=(S // tc,),
            in_specs=[
                pl.BlockSpec((tc, B, H), lambda c: (c, 0, 0)),   # x_proj chunk
                pl.BlockSpec((1, B, H), lambda c: (0, 0, 0)),    # h0 (resident)
                pl.BlockSpec((H, H), lambda c: (0, 0)),          # W_hh (resident)
            ],
            out_specs=pl.BlockSpec((tc, B, H), lambda c: (c, 0, 0)),
            scratch_shapes=[pltpu.VMEM((B, H), jnp.float32)],    # hidden carry
        ),
        compiler_params=pltpu.CompilerParams(
            dimension_semantics=("arbitrary",),   # true recurrence over time
        ),
    )(x_proj, h0, w_hh)

    h_final = y[S - 1:S]                                           # (1, B, H)

    # --- Pallas 2: batched projection (S*B, H) @ (H, V) + b_q ----------------
    w_hq = params["W_hq"].T.astype(compute_dtype)                  # (H, V)
    b_q = params["b_q"].reshape(1, V).astype(jnp.float32)          # (1, V)
    y_flat = y.reshape(S * B, H)
    M = S * B
    tm = _pick_tile(M, 256)     # sublane-aligned M tiles
    tn = _pick_tile(V, 512)     # lane-dense vocab tiles (streams W_hq on v7x)

    logits = pl.pallas_call(
        _projection_kernel,
        out_shape=jax.ShapeDtypeStruct((M, V), jnp.float32),
        grid_spec=pltpu.PrefetchScalarGridSpec(
            num_scalar_prefetch=0,
            grid=(M // tm, V // tn),
            in_specs=[
                pl.BlockSpec((tm, H), lambda i, j: (i, 0)),
                pl.BlockSpec((H, tn), lambda i, j: (0, j)),
                pl.BlockSpec((1, tn), lambda i, j: (0, j)),
            ],
            out_specs=pl.BlockSpec((tm, tn), lambda i, j: (i, j)),
        ),
        compiler_params=pltpu.CompilerParams(
            dimension_semantics=("parallel", "parallel"),
        ),
    )(y_flat, w_hq, b_q)

    return logits, h_final


# ---------------------------------------------------------------------------
# Pure-JAX reference (faithful to the PyTorch forward) for verification.
# ---------------------------------------------------------------------------
def _reference_forward(inputs, state, params, vocab_size):
    hp = jax.lax.Precision.HIGHEST
    x = jax.nn.one_hot(inputs.T, vocab_size, dtype=jnp.float32)    # (S, B, V)
    w_xh = params["W_ih"].T
    w_hh = params["W_hh"].T
    b_h = params["b_ih"] + params["b_hh"]

    def step(h, x_t):
        h_new = jnp.tanh(jnp.dot(x_t, w_xh, precision=hp)
                         + jnp.dot(h, w_hh, precision=hp) + b_h)
        return h_new, h_new

    hT, ys = jax.lax.scan(step, state[0], x)
    out = (jnp.dot(ys.reshape(-1, ys.shape[-1]), params["W_hq"].T, precision=hp)
           + params["b_q"])
    return out, hT[None]


if __name__ == "__main__":
    # Small, layout-friendly shapes (B multiple of 8, H/V multiples of 128).
    batch, seq, vocab, hidden = 8, 16, 128, 128

    key = jax.random.PRNGKey(0)
    k_in, k1, k2, k3, k4, k5, k6 = jax.random.split(key, 7)

    inputs = jax.random.randint(k_in, (batch, seq), 0, vocab, dtype=jnp.int32)
    state = jnp.zeros((1, batch, hidden), jnp.float32)   # begin_state()

    scale = 0.1
    params = {
        "W_ih": scale * jax.random.normal(k1, (hidden, vocab), jnp.float32),
        "W_hh": scale * jax.random.normal(k2, (hidden, hidden), jnp.float32),
        "b_ih": scale * jax.random.normal(k3, (hidden,), jnp.float32),
        "b_hh": scale * jax.random.normal(k4, (hidden,), jnp.float32),
        "W_hq": scale * jax.random.normal(k5, (vocab, hidden), jnp.float32),
        "b_q": scale * jax.random.normal(k6, (vocab,), jnp.float32),
    }

    out, new_state = rnn_model_forward(inputs, state, params, vocab)
    jax.block_until_ready((out, new_state))

    ref_out, ref_state = _reference_forward(inputs, state, params, vocab)
    assert out.shape == (seq * batch, vocab)
    assert new_state.shape == (1, batch, hidden)
    assert jnp.allclose(out, ref_out, atol=1e-4, rtol=1e-4)
    assert jnp.allclose(new_state, ref_state, atol=1e-4, rtol=1e-4)

    print("KERNEL_OK")
</pallas_src>

<mosaic_0001>
module attributes {stable_mosaic.version = 11 : i64} {
  func.func @_rnn_recurrence_kernel(%arg0: i32, %arg1: memref<8x8x128xf32, #tpu.memory_space<vmem>>, %arg2: memref<1x8x128xf32, #tpu.memory_space<vmem>>, %arg3: memref<128x128xf32, #tpu.memory_space<vmem>>, %arg4: memref<8x8x128xf32, #tpu.memory_space<vmem>>, %arg5: memref<8x128xf32, #tpu.memory_space<vmem>>) attributes {dimension_semantics = [#tpu.dimension_semantics<arbitrary>], iteration_bounds = array<i64: 2>, scalar_prefetch = 0 : i64, scratch_operands = 1 : i64, tpu.core_type = #tpu.core_type<tc>, window_params = [{transform_indices = @transform_0, window_bounds = array<i64: 8, 8, 128>}, {pipeline_mode = #tpu.pipeline_mode<synchronous>, transform_indices = @transform_1, window_bounds = array<i64: 1, 8, 128>}, {pipeline_mode = #tpu.pipeline_mode<synchronous>, transform_indices = @transform_2, window_bounds = array<i64: 128, 128>}, {transform_indices = @transform_3, window_bounds = array<i64: 8, 8, 128>}]} {
    %c0_i32 = arith.constant 0 : i32
    %0 = arith.cmpi eq, %arg0, %c0_i32 : i32
    %1 = arith.extui %0 : i1 to i32
    %c0_i32_0 = arith.constant 0 : i32
    %2 = arith.cmpi ne, %1, %c0_i32_0 : i32
    scf.if %2 {
      %c0_54 = arith.constant 0 : index
      %c0_55 = arith.constant 0 : index
      %c0_56 = arith.constant 0 : index
      %70 = vector.load %arg2[%c0_54, %c0_55, %c0_56] : memref<1x8x128xf32, #tpu.memory_space<vmem>>, vector<1x8x128xf32>
      %71 = vector.shape_cast %70 : vector<1x8x128xf32> to vector<8x128xf32>
      %c0_57 = arith.constant 0 : index
      %c0_58 = arith.constant 0 : index
      %72 = vector.load %arg5[%c0_57, %c0_58] : memref<8x128xf32, #tpu.memory_space<vmem>>, vector<8x128xf32>
      tpu.vector_store %arg5[%c0_57, %c0_58], %71 {strides = array<i32>} : memref<8x128xf32, #tpu.memory_space<vmem>>, vector<8x128xf32>,
    } else {
    }
    %c0 = arith.constant 0 : index
    %c0_1 = arith.constant 0 : index
    %3 = vector.load %arg3[%c0, %c0_1] : memref<128x128xf32, #tpu.memory_space<vmem>>, vector<128x128xf32>
    %c0_2 = arith.constant 0 : index
    %c0_3 = arith.constant 0 : index
    %4 = vector.load %arg5[%c0_2, %c0_3] : memref<8x128xf32, #tpu.memory_space<vmem>>, vector<8x128xf32>
    %c0_4 = arith.constant 0 : index
    %c0_5 = arith.constant 0 : index
    %c0_6 = arith.constant 0 : index
    %5 = vector.load %arg1[%c0_4, %c0_5, %c0_6] : memref<8x8x128xf32, #tpu.memory_space<vmem>>, vector<1x8x128xf32>
    %6 = vector.shape_cast %5 : vector<1x8x128xf32> to vector<8x128xf32>
    %cst = arith.constant dense<0.000000e+00> : vector<8x128xf32>
    %7 = tpu.matmul %4, %3, %cst {dimension_numbers = #tpu.dot_dimension_numbers<[1], [0], [0], [1], [0, 0, 1, 1], [], []>} : vector<8x128xf32>, vector<128x128xf32>, vector<8x128xf32> -> vector<8x128xf32>
    %8 = arith.addf %6, %7 : vector<8x128xf32>
    %9 = math.tanh %8 : vector<8x128xf32>
    %c0_7 = arith.constant 0 : index
    %c0_8 = arith.constant 0 : index
    %c0_9 = arith.constant 0 : index
    %10 = vector.load %arg4[%c0_7, %c0_8, %c0_9] : memref<8x8x128xf32, #tpu.memory_space<vmem>>, vector<1x8x128xf32>
    %11 = vector.shape_cast %10 : vector<1x8x128xf32> to vector<8x128xf32>
    %12 = vector.shape_cast %9 : vector<8x128xf32> to vector<1x8x128xf32>
    tpu.vector_store %arg4[%c0_7, %c0_8, %c0_9], %12 {strides = array<i32>} : memref<8x8x128xf32, #tpu.memory_space<vmem>>, vector<1x8x128xf32>,
    %c1 = arith.constant 1 : index
    %c0_10 = arith.constant 0 : index
    %c0_11 = arith.constant 0 : index
    %13 = vector.load %arg1[%c1, %c0_10, %c0_11] : memref<8x8x128xf32, #tpu.memory_space<vmem>>, vector<1x8x128xf32>
    %14 = vector.shape_cast %13 : vector<1x8x128xf32> to vector<8x128xf32>
    %cst_12 = arith.constant dense<0.000000e+00> : vector<8x128xf32>
    %15 = tpu.matmul %9, %3, %cst_12 {dimension_numbers = #tpu.dot_dimension_numbers<[1], [0], [0], [1], [0, 0, 1, 1], [], []>} : vector<8x128xf32>, vector<128x128xf32>, vector<8x128xf32> -> vector<8x128xf32>
    %16 = arith.addf %14, %15 : vector<8x128xf32>
    %17 = math.tanh %16 : vector<8x128xf32>
    %c1_13 = arith.constant 1 : index
    %c0_14 = arith.constant 0 : index
    %c0_15 = arith.constant 0 : index
    %18 = vector.load %arg4[%c1_13, %c0_14, %c0_15] : memref<8x8x128xf32, #tpu.memory_space<vmem>>, vector<1x8x128xf32>
    %19 = vector.shape_cast %18 : vector<1x8x128xf32> to vector<8x128xf32>
    %20 = vector.shape_cast %17 : vector<8x128xf32> to vector<1x8x128xf32>
    tpu.vector_store %arg4[%c1_13, %c0_14, %c0_15], %20 {strides = array<i32>} : memref<8x8x128xf32, #tpu.memory_space<vmem>>, vector<1x8x128xf32>,
    %c2 = arith.constant 2 : index
    %c0_16 = arith.constant 0 : index
    %c0_17 = arith.constant 0 : index
    %21 = vector.load %arg1[%c2, %c0_16, %c0_17] : memref<8x8x128xf32, #tpu.memory_space<vmem>>, vector<1x8x128xf32>
    %22 = vector.shape_cast %21 : vector<1x8x128xf32> to vector<8x128xf32>
    %cst_18 = arith.constant dense<0.000000e+00> : vector<8x128xf32>
    %23 = tpu.matmul %17, %3, %cst_18 {dimension_numbers = #tpu.dot_dimension_numbers<[1], [0], [0], [1], [0, 0, 1, 1], [], []>} : vector<8x128xf32>, vector<128x128xf32>, vector<8x128xf32> -> vector<8x128xf32>
    %24 = arith.addf %22, %23 : vector<8x128xf32>
    %25 = math.tanh %24 : vector<8x128xf32>
    %c2_19 = arith.constant 2 : index
    %c0_20 = arith.constant 0 : index
    %c0_21 = arith.constant 0 : index
    %26 = vector.load %arg4[%c2_19, %c0_20, %c0_21] : memref<8x8x128xf32, #tpu.memory_space<vmem>>, vector<1x8x128xf32>
    %27 = vector.shape_cast %26 : vector<1x8x128xf32> to vector<8x128xf32>
    %28 = vector.shape_cast %25 : vector<8x128xf32> to vector<1x8x128xf32>
    tpu.vector_store %arg4[%c2_19, %c0_20, %c0_21], %28 {strides = array<i32>} : memref<8x8x128xf32, #tpu.memory_space<vmem>>, vector<1x8x128xf32>,
    %c3 = arith.constant 3 : index
    %c0_22 = arith.constant 0 : index
    %c0_23 = arith.constant 0 : index
    %29 = vector.load %arg1[%c3, %c0_22, %c0_23] : memref<8x8x128xf32, #tpu.memory_space<vmem>>, vector<1x8x128xf32>
    %30 = vector.shape_cast %29 : vector<1x8x128xf32> to vector<8x128xf32>
    %cst_24 = arith.constant dense<0.000000e+00> : vector<8x128xf32>
    %31 = tpu.matmul %25, %3, %cst_24 {dimension_numbers = #tpu.dot_dimension_numbers<[1], [0], [0], [1], [0, 0, 1, 1], [], []>} : vector<8x128xf32>, vector<128x128xf32>, vector<8x128xf32> -> vector<8x128xf32>
    %32 = arith.addf %30, %31 : vector<8x128xf32>
    %33 = math.tanh %32 : vector<8x128xf32>
    %c3_25 = arith.constant 3 : index
    %c0_26 = arith.constant 0 : index
    %c0_27 = arith.constant 0 : index
    %34 = vector.load %arg4[%c3_25, %c0_26, %c0_27] : memref<8x8x128xf32, #tpu.memory_space<vmem>>, vector<1x8x128xf32>
    %35 = vector.shape_cast %34 : vector<1x8x128xf32> to vector<8x128xf32>
    %36 = vector.shape_cast %33 : vector<8x128xf32> to vector<1x8x128xf32>
    tpu.vector_store %arg4[%c3_25, %c0_26, %c0_27], %36 {strides = array<i32>} : memref<8x8x128xf32, #tpu.memory_space<vmem>>, vector<1x8x128xf32>,
    %c4 = arith.constant 4 : index
    %c0_28 = arith.constant 0 : index
    %c0_29 = arith.constant 0 : index
    %37 = vector.load %arg1[%c4, %c0_28, %c0_29] : memref<8x8x128xf32, #tpu.memory_space<vmem>>, vector<1x8x128xf32>
    %38 = vector.shape_cast %37 : vector<1x8x128xf32> to vector<8x128xf32>
    %cst_30 = arith.constant dense<0.000000e+00> : vector<8x128xf32>
    %39 = tpu.matmul %33, %3, %cst_30 {dimension_numbers = #tpu.dot_dimension_numbers<[1], [0], [0], [1], [0, 0, 1, 1], [], []>} : vector<8x128xf32>, vector<128x128xf32>, vector<8x128xf32> -> vector<8x128xf32>
    %40 = arith.addf %38, %39 : vector<8x128xf32>
    %41 = math.tanh %40 : vector<8x128xf32>
    %c4_31 = arith.constant 4 : index
    %c0_32 = arith.constant 0 : index
    %c0_33 = arith.constant 0 : index
    %42 = vector.load %arg4[%c4_31, %c0_32, %c0_33] : memref<8x8x128xf32, #tpu.memory_space<vmem>>, vector<1x8x128xf32>
    %43 = vector.shape_cast %42 : vector<1x8x128xf32> to vector<8x128xf32>
    %44 = vector.shape_cast %41 : vector<8x128xf32> to vector<1x8x128xf32>
    tpu.vector_store %arg4[%c4_31, %c0_32, %c0_33], %44 {strides = array<i32>} : memref<8x8x128xf32, #tpu.memory_space<vmem>>, vector<1x8x128xf32>,
    %c5 = arith.constant 5 : index
    %c0_34 = arith.constant 0 : index
    %c0_35 = arith.constant 0 : index
    %45 = vector.load %arg1[%c5, %c0_34, %c0_35] : memref<8x8x128xf32, #tpu.memory_space<vmem>>, vector<1x8x128xf32>
    %46 = vector.shape_cast %45 : vector<1x8x128xf32> to vector<8x128xf32>
    %cst_36 = arith.constant dense<0.000000e+00> : vector<8x128xf32>
    %47 = tpu.matmul %41, %3, %cst_36 {dimension_numbers = #tpu.dot_dimension_numbers<[1], [0], [0], [1], [0, 0, 1, 1], [], []>} : vector<8x128xf32>, vector<128x128xf32>, vector<8x128xf32> -> vector<8x128xf32>
    %48 = arith.addf %46, %47 : vector<8x128xf32>
    %49 = math.tanh %48 : vector<8x128xf32>
    %c5_37 = arith.constant 5 : index
    %c0_38 = arith.constant 0 : index
    %c0_39 = arith.constant 0 : index
    %50 = vector.load %arg4[%c5_37, %c0_38, %c0_39] : memref<8x8x128xf32, #tpu.memory_space<vmem>>, vector<1x8x128xf32>
    %51 = vector.shape_cast %50 : vector<1x8x128xf32> to vector<8x128xf32>
    %52 = vector.shape_cast %49 : vector<8x128xf32> to vector<1x8x128xf32>
    tpu.vector_store %arg4[%c5_37, %c0_38, %c0_39], %52 {strides = array<i32>} : memref<8x8x128xf32, #tpu.memory_space<vmem>>, vector<1x8x128xf32>,
    %c6 = arith.constant 6 : index
    %c0_40 = arith.constant 0 : index
    %c0_41 = arith.constant 0 : index
    %53 = vector.load %arg1[%c6, %c0_40, %c0_41] : memref<8x8x128xf32, #tpu.memory_space<vmem>>, vector<1x8x128xf32>
    %54 = vector.shape_cast %53 : vector<1x8x128xf32> to vector<8x128xf32>
    %cst_42 = arith.constant dense<0.000000e+00> : vector<8x128xf32>
    %55 = tpu.matmul %49, %3, %cst_42 {dimension_numbers = #tpu.dot_dimension_numbers<[1], [0], [0], [1], [0, 0, 1, 1], [], []>} : vector<8x128xf32>, vector<128x128xf32>, vector<8x128xf32> -> vector<8x128xf32>
    %56 = arith.addf %54, %55 : vector<8x128xf32>
    %57 = math.tanh %56 : vector<8x128xf32>
    %c6_43 = arith.constant 6 : index
    %c0_44 = arith.constant 0 : index
    %c0_45 = arith.constant 0 : index
    %58 = vector.load %arg4[%c6_43, %c0_44, %c0_45] : memref<8x8x128xf32, #tpu.memory_space<vmem>>, vector<1x8x128xf32>
    %59 = vector.shape_cast %58 : vector<1x8x128xf32> to vector<8x128xf32>
    %60 = vector.shape_cast %57 : vector<8x128xf32> to vector<1x8x128xf32>
    tpu.vector_store %arg4[%c6_43, %c0_44, %c0_45], %60 {strides = array<i32>} : memref<8x8x128xf32, #tpu.memory_space<vmem>>, vector<1x8x128xf32>,
    %c7 = arith.constant 7 : index
    %c0_46 = arith.constant 0 : index
    %c0_47 = arith.constant 0 : index
    %61 = vector.load %arg1[%c7, %c0_46, %c0_47] : memref<8x8x128xf32, #tpu.memory_space<vmem>>, vector<1x8x128xf32>
    %62 = vector.shape_cast %61 : vector<1x8x128xf32> to vector<8x128xf32>
    %cst_48 = arith.constant dense<0.000000e+00> : vector<8x128xf32>
    %63 = tpu.matmul %57, %3, %cst_48 {dimension_numbers = #tpu.dot_dimension_numbers<[1], [0], [0], [1], [0, 0, 1, 1], [], []>} : vector<8x128xf32>, vector<128x128xf32>, vector<8x128xf32> -> vector<8x128xf32>
    %64 = arith.addf %62, %63 : vector<8x128xf32>
    %65 = math.tanh %64 : vector<8x128xf32>
    %c7_49 = arith.constant 7 : index
    %c0_50 = arith.constant 0 : index
    %c0_51 = arith.constant 0 : index
    %66 = vector.load %arg4[%c7_49, %c0_50, %c0_51] : memref<8x8x128xf32, #tpu.memory_space<vmem>>, vector<1x8x128xf32>
    %67 = vector.shape_cast %66 : vector<1x8x128xf32> to vector<8x128xf32>
    %68 = vector.shape_cast %65 : vector<8x128xf32> to vector<1x8x128xf32>
    tpu.vector_store %arg4[%c7_49, %c0_50, %c0_51], %68 {strides = array<i32>} : memref<8x8x128xf32, #tpu.memory_space<vmem>>, vector<1x8x128xf32>,
    %c0_52 = arith.constant 0 : index
    %c0_53 = arith.constant 0 : index
    %69 = vector.load %arg5[%c0_52, %c0_53] : memref<8x128xf32, #tpu.memory_space<vmem>>, vector<8x128xf32>
    tpu.vector_store %arg5[%c0_52, %c0_53], %65 {strides = array<i32>} : memref<8x128xf32, #tpu.memory_space<vmem>>, vector<8x128xf32>,
    return
  }
  func.func @transform_0(%arg0: i32) -> (i32, i32, i32) {
    %c0_i32 = arith.constant 0 : i32
    %c0_i32_0 = arith.constant 0 : i32
    %c0_i32_1 = arith.constant 0 : i32
    return %arg0, %c0_i32, %c0_i32_0 : i32, i32, i32
  }
  func.func @transform_1(%arg0: i32) -> (i32, i32, i32) {
    %c0_i32 = arith.constant 0 : i32
    %c0_i32_0 = arith.constant 0 : i32
    %c0_i32_1 = arith.constant 0 : i32
    %c0_i32_2 = arith.constant 0 : i32
    return %c0_i32, %c0_i32_0, %c0_i32_1 : i32, i32, i32
  }
  func.func @transform_2(%arg0: i32) -> (i32, i32) {
    %c0_i32 = arith.constant 0 : i32
    %c0_i32_0 = arith.constant 0 : i32
    %c0_i32_1 = arith.constant 0 : i32
    return %c0_i32, %c0_i32_0 : i32, i32
  }
  func.func @transform_3(%arg0: i32) -> (i32, i32, i32) {
    %c0_i32 = arith.constant 0 : i32
    %c0_i32_0 = arith.constant 0 : i32
    %c0_i32_1 = arith.constant 0 : i32
    return %arg0, %c0_i32, %c0_i32_0 : i32, i32, i32
  }
}

</mosaic_0001>

<bundles_post_ra>
// kernel: tpu_custom_call.1
= control target key start
LH: loop header
LB: loop body
LE: loop exit
PB: predicated region body
PF: predicated region fallthrough
CT: control target
= control target key end

     0   :  { %s1201_s0 = inlined_call_operand.hbm [shape: f32[16,8,128], index: 0, kind: input, shape index: {}]   ;;  %s1202_s1 = inlined_call_operand.hbm [shape: f32[1,8,128], index: 1, kind: input, shape index: {}]   ;;  %s1203_s2 = inlined_call_operand.hbm [shape: f32[128,128], index: 2, kind: input, shape index: {}]   ;;  %s1204_s3 = inlined_call_operand.hbm [shape: f32[16,8,128], index: 3, kind: output, shape index: {}]  }
   0x1   :  { %1205 = sst [smem:[#allocation13_spill]] %s1202_s1 }
   0x2   :  { %1206 = sst [smem:[#allocation14_spill]] %s1203_s2 }
   0x3   :  { %8 = vsyncpa [#allocation4], 0 }
   0x4   :  { %10 = vsyncpa [#allocation4 + $0x1], 0 }
   0x5   :  { %11 = vsyncpa [#allocation7], 0 }
   0x6   :  { %12 = vsyncpa [#allocation5], 0 }
   0x7   :  { %14 = vsyncpa [#allocation5 + $0x1], 0  ;;  %s872_s12 = smov 0   ;;  %s874_s13 = smov 0  }
   0x8   :  { %s876_s14 = smov 0   ;;  %s878_s15 = smov 0  }
   0x9 LB: > { %s893_s16 = sadd.s32 4294967295, %s844_s15   ;;  %s562_s17 = sadd.s32 4294967294, %s844_s15   ;;  %s844_s15 = sphi %s878_s15, %s1220_s15   ;;  %s840_s14 = sphi %s876_s14, %s1219_s14   ;;  %s836_s13 = sphi %s874_s13, %s1218_s13   ;;  %s832_s12 = sphi %s872_s12, %s1217_s12  }
   0xa   : > { %s897_s18 = sadd.s32 1, %s844_s15   ;;  %s27_s19 = sadd.s32 1, %s840_s14 }
   0xb   : > { %s24_s20 = ssub.s32 %s844_s15, %s897_s18  ;;  %p34_p0 = scmp.ne.s32.totalorder %s840_s14, %s836_s13 }
   0xc   : > { %p25_p1 = scmp.eq.s32.totalorder %s24_s20, 0  ;;  %p35_p2 = scmp.eq.s32.totalorder %s844_s15, 0 }
   0xd   : > { %p40_p3 = scmp.ne.s32.totalorder %s836_s13, %s832_s12  ;;  %p41_p4 = scmp.eq.s32.totalorder %s893_s16, 0 }
   0xe   : > { %s909_s21 = scalar_select %p25_p1, %s840_s14, %s27_s19  }
   0xf   : > { %p911_p5 = por %p35_p2, %p34_p0  ;;  %p917_p6 = por %p41_p4, %p40_p3 }
  0x10   : > { %p106_p7 = scmp.eq.s32.totalorder %s893_s16, 1  ;;  %p112_p8 = scmp.eq.s32.totalorder %s562_s17, 1 }
  0x11   : > { %p563_p9 = scmp.ge.s32.totalorder %s844_s15, 1  ;;  %p119_p10 = scmp.lt.s32.totalorder %s844_s15, 3 }
  0x12   : > { %p924_p11 = por %p106_p7, %p34_p0  ;;  %p928_p12 = por %p112_p8, %p40_p3 }
  0x13   : > { %p932_p13 = pnand %p563_p9, %p119_p10  ;;  %s1212_s1 = sld [smem:[#allocation13_spill]] }
  0x14   : > { %s846_s30 = smov [#allocation6]   ;;  %p626_p7 = scmp.lt.s32.totalorder %s844_s15, 2 }
  0x15   : > { %p609_p0 = pneg %p932_p13  ;;  %s133_s4 = sshll.u32 %s846_s30, 4  ;;  %s134_s4 = int_to_ptr.vmem [resolvable:$true] %s133_s4 }
  0x16   : > { %s1213_s2 = sld [smem:[#allocation14_spill]]  ;;  %p951_p8 = pnand %p626_p7, %p911_p5 }
  0x17   : > { %p610_p3 = pnand %p609_p0, %p41_p4  ;;  %s847_s9 = smov [#allocation8]  }
  0x18   : > { %s144_s10 = sshll.u32 %s847_s9, 4  ;;  %s158_s11 = sand.u32 1, %s840_s14   ;;  %s145_s10 = int_to_ptr.vmem [resolvable:$true] %s144_s10 }
  0x19   : > { %s131_s29 = sshll.u32 %s1212_s1, 4  ;;  %s848_s17 = smov 128   ;;  %s132_s29 = int_to_ptr.hbm [resolvable:$true] %s131_s29 }
  0x1a   : > { %612 = dma.hbm_to_vmem [thread:$0]  (!%p610_p3), %s132_s29, 128, %s134_s4, [#allocation7]  }
  0x1b   : > { %s849_s19 = smov 8   ;;  %s567_s20 = sshll.u32 %s158_s11, 6 }
  0x1c   : > { %s142_s7 = sshll.u32 %s1213_s2, 4  ;;  %s595_s27 = sshll.u32 %s844_s15, 6  ;;  %s143_s7 = int_to_ptr.hbm [resolvable:$true] %s142_s7 }
  0x1d   : > { %615 = dma.hbm_to_vmem [thread:$0]  (!%p610_p3), %s143_s7, 2048, %s145_s10, [#allocation7], %s848_s17, %s848_s17, %s849_s19  }
  0x1e   : > { %s167_s5 = scalar_lea.hbm %s1201_s0, %s595_s27  ;;  %s162_s29 = scalar_lea.vmem [#allocation3], %s567_s20 }
  0x1f   : > { %s170_s22 = sshll.u32 %s162_s29, 4  ;;  %s168_s4 = sshll.u32 %s167_s5, 4  ;;  %s171_s22 = int_to_ptr.vmem [resolvable:$true] %s170_s22  ;;  %s169_s4 = int_to_ptr.hbm [resolvable:$true] %s168_s4 }
  0x20   : > { %s159_s6 = scalar_lea.sflag [#allocation4], %s158_s11  ;;  %s744_s1 = sshra.s32 %s169_s4, 4  ;;  %s745_s1 = int_to_ptr.hbm [resolvable:$true] %s744_s1 }
  0x21   : > { %s746_s9 = scalar_lea.hbm %s745_s1, 64  ;;  %p748_p9 = pneg %p951_p8 }
  0x22   : > { %p747_p5 = scmp.ne.s32.totalorder %s745_s1, %s746_s9  ;;  %s751_s2 = scalar_lea.hbm %s1201_s0, 128 }
  0x23   : > { %p752_p3 = scmp.lt.s32.totalorder %s745_s1, %s1201_s0  ;;  %p753_p7 = scmp.lt.s32.totalorder %s751_s2, %s746_s9 }
  0x24   : > { %p749_p10 = pnand %p748_p9, %p747_p5 }
  0x25   : > { %p754_p2 = por %p753_p7, %p752_p3 }
  0x26   : > { %p750_p0 = pneg %p749_p10 }
  0x28   : > { %p755_p1 = pnand %p754_p2, %p750_p0 }
  0x2a   : > { %758 = shalt.err (!%p755_p1)
}
  0x2b   : > { %619 = dma.hbm_to_vmem [thread:$0]  (!%p951_p8), %s169_s4, 1024, %s171_s22, %s159_s6, %s848_s17, %s848_s17, %s849_s19  }
  0x2c   : > { %182 = sbr.rel (%p932_p13) target bundleno = 1202 (0x4b2), region = 32  ;;  %s973_s11 = sand.u32 (!%p932_p13), 1, %s836_s13  }
  0x2d   : > { %s571_s20 = sshll.u32 (!%p932_p13), %s973_s11, 6  ;;  %s185_s30 = scalar_lea.sflag (!%p932_p13), [#allocation4], %s973_s11 }
  0x2e   : > { %s977_s5 = scalar_lea.vmem (!%p932_p13), [#allocation3], %s571_s20 }
  0x31   : > { %819 = dma.done.wait (%p917_p6), %s185_s30, 1024  }
  0x32   : > { %821 = vsyncadd (%p917_p6), %s185_s30, 4294966272 }
  0x33   : > { %823 = dma.done.wait (%p41_p4), [#allocation7], 2176  }
  0x34   : > { %825 = vsyncadd (%p41_p4), [#allocation7], 4294965120  ;;  %s987_s1 = scalar_lea.vmem [#allocation9], %s571_s20  ;;  %p1215_p13 = scmp.ne.s32.totalorder %s893_s16, 0 }
  0x36   : > { %227 = sbr.rel (%p1215_p13) target bundleno = 61 (0x3d), region = 48 }
  0x3b   : > { %v228_v0 = vld [vmem:[#allocation6] sm:$0xff] }
  0x3c   : > { %229 = vst [vmem:[#allocation2] sm:$0xff] %v228_v0 }
  0x3d PF: > { %v991_v1 = vld [vmem:[#allocation8 + $0x78] sm:$0xff]  ;;  %v993_v2 = vld [vmem:[#allocation8 + $0x70] sm:$0xff]  ;;  %v997_v3 = vld [vmem:[#allocation8 + $0x68] sm:$0xff]  ;;  %s596_s2 = sshll.u32 %s893_s16, 6  ;;  %s467_s17 = sshll.u32 %s987_s1, 4  ;;  %s468_s17 = int_to_ptr.vmem [resolvable:$true] %s467_s17 }
  0x3e   : > { %248 = vmatpush.msra.mxu0 %v991_v1  ;;  %273 = vmatpush.msra.mxu1 %v991_v1  ;;  %v1003_v4 = vld [vmem:[#allocation8 + $0x60] sm:$0xff]  ;;  %v1009_v5 = vld [vmem:[#allocation8 + $0x58] sm:$0xff]  ;;  %v1015_v6 = vld [vmem:[#allocation8 + $0x50] sm:$0xff]  ;;  %s466_s8 = scalar_lea.hbm %s1204_s3, %s596_s2  ;;  %s455_s29 = scalar_lea.sflag [#allocation5], %s973_s11 }
  0x3f   : > { %299 = vmatpush.msra.mxu2 %v991_v1  ;;  %325 = vmatpush.msra.mxu3 %v991_v1  ;;  %v1021_v7 = vld [vmem:[#allocation8 + $0x48] sm:$0xff]  ;;  %v1027_v8 = vld [vmem:[#allocation8 + $0x40] sm:$0xff]  ;;  %v1033_v9 = vld [vmem:[#allocation8 + $0x38] sm:$0xff]  ;;  %s469_s19 = sshll.u32 %s466_s8, 4  ;;  %s794_s9 = scalar_lea.hbm %s1204_s3, 128  ;;  %s470_s19 = int_to_ptr.hbm [resolvable:$true] %s469_s19 }
  0x40   : > { %249 = vmatpush.msra.mxu0 %v993_v2  ;;  %274 = vmatpush.msra.mxu1 %v993_v2  ;;  %v1039_v10 = vld [vmem:[#allocation8 + $0x30] sm:$0xff]  ;;  %v1045_v11 = vld [vmem:[#allocation8 + $0x28] sm:$0xff]  ;;  %v1051_v12 = vld [vmem:[#allocation8 + $0x20] sm:$0xff]  ;;  %s788_s22 = sshra.s32 %s470_s19, 4  ;;  %s789_s22 = int_to_ptr.hbm [resolvable:$true] %s788_s22 }
  0x41   : > { %300 = vmatpush.msra.mxu2 %v993_v2  ;;  %326 = vmatpush.msra.mxu3 %v993_v2  ;;  %v1057_v13 = vld [vmem:[#allocation8 + $0x18] sm:$0xff]  ;;  %v1063_v14 = vld [vmem:[#allocation8 + $0x10] sm:$0xff]  ;;  %v1069_v15 = vld [vmem:[#allocation8 + $0x8] sm:$0xff]  ;;  %s790_s4 = scalar_lea.hbm %s789_s22, 64  ;;  %p795_p2 = scmp.lt.s32.totalorder %s789_s22, %s1204_s3 }
  0x42   : > { %250 = vmatpush.msra.mxu0 %v997_v3  ;;  %275 = vmatpush.msra.mxu1 %v997_v3  ;;  %v1075_v16 = vld [vmem:[#allocation8] sm:$0xff]  ;;  %v247_v18 = vld [vmem:[%s977_s5] sm:$0xff]  ;;  %v578_v26 = vld [vmem:[%s977_s5 + $0x10] sm:$0xff]  ;;  %p791_p4 = scmp.ne.s32.totalorder %s789_s22, %s790_s4  ;;  %p796_p8 = scmp.lt.s32.totalorder %s794_s9, %s790_s4 }
  0x43   : > { %301 = vmatpush.msra.mxu2 %v997_v3  ;;  %327 = vmatpush.msra.mxu3 %v997_v3  ;;  %v246_v17 = vld [vmem:[#allocation2] sm:$0xff]  ;;  %v576_v22 = vld [vmem:[%s977_s5 + $0x8] sm:$0xff]  ;;  %v582_v34 = vld [vmem:[%s977_s5 + $0x20] sm:$0xff] }
  0x44   : > { %251 = vmatpush.msra.mxu0 %v1003_v4  ;;  %276 = vmatpush.msra.mxu1 %v1003_v4  ;;  %v580_v30 = vld [vmem:[%s977_s5 + $0x18] sm:$0xff]  ;;  %v584_v38 = vld [vmem:[%s977_s5 + $0x28] sm:$0xff]  ;;  %v586_v42 = vld [vmem:[%s977_s5 + $0x30] sm:$0xff]  ;;  %p792_p6 = pnand %p791_p4, %p924_p11  ;;  %p797_p5 = por %p796_p8, %p795_p2 }
  0x45   : > { %302 = vmatpush.msra.mxu2 %v1003_v4  ;;  %328 = vmatpush.msra.mxu3 %v1003_v4  ;;  %v588_v46 = vld [vmem:[%s977_s5 + $0x38] sm:$0xff] }
  0x46   : > { %252 = vmatpush.msra.mxu0 %v1009_v5  ;;  %277 = vmatpush.msra.mxu1 %v1009_v5  ;;  %p793_p1 = pneg %p792_p6 }
  0x47   : > { %303 = vmatpush.msra.mxu2 %v1009_v5  ;;  %329 = vmatpush.msra.mxu3 %v1009_v5 }
  0x48   : > { %253 = vmatpush.msra.mxu0 %v1015_v6  ;;  %278 = vmatpush.msra.mxu1 %v1015_v6  ;;  %p798_p9 = pnand %p797_p5, %p793_p1 }
  0x49   : > { %304 = vmatpush.msra.mxu2 %v1015_v6  ;;  %330 = vmatpush.msra.mxu3 %v1015_v6 }
  0x4a   : > { %254 = vmatpush.msra.mxu0 %v1021_v7  ;;  %279 = vmatpush.msra.mxu1 %v1021_v7 }
  0x4b   : > { %305 = vmatpush.msra.mxu2 %v1021_v7  ;;  %331 = vmatpush.msra.mxu3 %v1021_v7 }
  0x4c   : > { %255 = vmatpush.msra.mxu0 %v1027_v8  ;;  %280 = vmatpush.msra.mxu1 %v1027_v8 }
  0x4d   : > { %306 = vmatpush.msra.mxu2 %v1027_v8  ;;  %332 = vmatpush.msra.mxu3 %v1027_v8 }
  0x4e   : > { %256 = vmatpush.msra.mxu0 %v1033_v9  ;;  %281 = vmatpush.msra.mxu1 %v1033_v9 }
  0x4f   : > { %307 = vmatpush.msra.mxu2 %v1033_v9  ;;  %333 = vmatpush.msra.mxu3 %v1033_v9 }
  0x50   : > { %257 = vmatpush.msra.mxu0 %v1039_v10  ;;  %282 = vmatpush.msra.mxu1 %v1039_v10 }
  0x51   : > { %308 = vmatpush.msra.mxu2 %v1039_v10  ;;  %334 = vmatpush.msra.mxu3 %v1039_v10 }
  0x52   : > { %258 = vmatpush.msra.mxu0 %v1045_v11  ;;  %283 = vmatpush.msra.mxu1 %v1045_v11 }
  0x53   : > { %309 = vmatpush.msra.mxu2 %v1045_v11  ;;  %335 = vmatpush.msra.mxu3 %v1045_v11 }
  0x54   : > { %259 = vmatpush.msra.mxu0 %v1051_v12  ;;  %284 = vmatpush.msra.mxu1 %v1051_v12 }
  0x55   : > { %310 = vmatpush.msra.mxu2 %v1051_v12  ;;  %336 = vmatpush.msra.mxu3 %v1051_v12 }
  0x56   : > { %260 = vmatpush.msra.mxu0 %v1057_v13  ;;  %285 = vmatpush.msra.mxu1 %v1057_v13 }
  0x57   : > { %311 = vmatpush.msra.mxu2 %v1057_v13  ;;  %337 = vmatpush.msra.mxu3 %v1057_v13 }
  0x58   : > { %261 = vmatpush.msra.mxu0 %v1063_v14  ;;  %286 = vmatpush.msra.mxu1 %v1063_v14 }
  0x59   : > { %312 = vmatpush.msra.mxu2 %v1063_v14  ;;  %338 = vmatpush.msra.mxu3 %v1063_v14 }
  0x5a   : > { %262 = vmatpush.msra.mxu0 %v1069_v15  ;;  %287 = vmatpush.msra.mxu1 %v1069_v15 }
  0x5b   : > { %313 = vmatpush.msra.mxu2 %v1069_v15  ;;  %339 = vmatpush.msra.mxu3 %v1069_v15 }
  0x5c   : > { %263 = vmatpush.msra.mxu0 %v1075_v16  ;;  %288 = vmatpush.msra.mxu1 %v1075_v16 }
  0x5d   : > { %264 = vmatmul.f32.vlgmr.msra.gmra.mxu0 %v246_v17  ;;  %314 = vmatpush.msra.mxu2 %v1075_v16 }
  0x5e   : > { %340 = vmatpush.msra.mxu3 %v1075_v16  ;;  %351 = vmatpush.msrb.mxu0 %v991_v1 }
  0x5f   : > { %377 = vmatpush.msrb.mxu1 %v991_v1  ;;  %403 = vmatpush.msrb.mxu2 %v991_v1 }
  0x60   : > { %352 = vmatpush.msrb.mxu0 %v993_v2  ;;  %429 = vmatpush.msrb.mxu3 %v991_v1 }
  0x61   : > { %378 = vmatpush.msrb.mxu1 %v993_v2  ;;  %404 = vmatpush.msrb.mxu2 %v993_v2 }
  0x62   : > { %353 = vmatpush.msrb.mxu0 %v997_v3  ;;  %430 = vmatpush.msrb.mxu3 %v993_v2 }
  0x63   : > { %379 = vmatpush.msrb.mxu1 %v997_v3  ;;  %405 = vmatpush.msrb.mxu2 %v997_v3 }
  0x64   : > { %354 = vmatpush.msrb.mxu0 %v1003_v4  ;;  %431 = vmatpush.msrb.mxu3 %v997_v3 }
  0x65   : > { %380 = vmatpush.msrb.mxu1 %v1003_v4  ;;  %406 = vmatpush.msrb.mxu2 %v1003_v4 }
  0x66   : > { %355 = vmatpush.msrb.mxu0 %v1009_v5  ;;  %432 = vmatpush.msrb.mxu3 %v1003_v4 }
  0x67   : > { %381 = vmatpush.msrb.mxu1 %v1009_v5  ;;  %407 = vmatpush.msrb.mxu2 %v1009_v5 }
  0x68   : > { %356 = vmatpush.msrb.mxu0 %v1015_v6  ;;  %433 = vmatpush.msrb.mxu3 %v1009_v5 }
  0x69   : > { %382 = vmatpush.msrb.mxu1 %v1015_v6  ;;  %408 = vmatpush.msrb.mxu2 %v1015_v6 }
  0x6a   : > { %357 = vmatpush.msrb.mxu0 %v1021_v7  ;;  %434 = vmatpush.msrb.mxu3 %v1015_v6 }
  0x6b   : > { %383 = vmatpush.msrb.mxu1 %v1021_v7  ;;  %409 = vmatpush.msrb.mxu2 %v1021_v7 }
  0x6c   : > { %358 = vmatpush.msrb.mxu0 %v1027_v8  ;;  %435 = vmatpush.msrb.mxu3 %v1021_v7 }
  0x6d   : > { %384 = vmatpush.msrb.mxu1 %v1027_v8  ;;  %410 = vmatpush.msrb.mxu2 %v1027_v8 }
  0x6e   : > { %359 = vmatpush.msrb.mxu0 %v1033_v9  ;;  %436 = vmatpush.msrb.mxu3 %v1027_v8 }
  0x6f   : > { %385 = vmatpush.msrb.mxu1 %v1033_v9  ;;  %411 = vmatpush.msrb.mxu2 %v1033_v9 }
  0x70   : > { %360 = vmatpush.msrb.mxu0 %v1039_v10  ;;  %437 = vmatpush.msrb.mxu3 %v1033_v9 }
  0x71   : > { %386 = vmatpush.msrb.mxu1 %v1039_v10  ;;  %412 = vmatpush.msrb.mxu2 %v1039_v10 }
  0x72   : > { %361 = vmatpush.msrb.mxu0 %v1045_v11  ;;  %438 = vmatpush.msrb.mxu3 %v1039_v10 }
  0x73   : > { %387 = vmatpush.msrb.mxu1 %v1045_v11  ;;  %413 = vmatpush.msrb.mxu2 %v1045_v11 }
  0x74   : > { %362 = vmatpush.msrb.mxu0 %v1051_v12  ;;  %439 = vmatpush.msrb.mxu3 %v1045_v11 }
  0x75   : > { %388 = vmatpush.msrb.mxu1 %v1051_v12  ;;  %414 = vmatpush.msrb.mxu2 %v1051_v12 }
  0x76   : > { %363 = vmatpush.msrb.mxu0 %v1057_v13  ;;  %440 = vmatpush.msrb.mxu3 %v1051_v12 }
  0x77   : > { %389 = vmatpush.msrb.mxu1 %v1057_v13  ;;  %415 = vmatpush.msrb.mxu2 %v1057_v13 }
  0x78   : > { %364 = vmatpush.msrb.mxu0 %v1063_v14  ;;  %441 = vmatpush.msrb.mxu3 %v1057_v13 }
  0x79   : > { %390 = vmatpush.msrb.mxu1 %v1063_v14  ;;  %416 = vmatpush.msrb.mxu2 %v1063_v14 }
  0x7a   : > { %365 = vmatpush.msrb.mxu0 %v1069_v15  ;;  %442 = vmatpush.msrb.mxu3 %v1063_v14 }
  0x7b   : > { %391 = vmatpush.msrb.mxu1 %v1069_v15  ;;  %417 = vmatpush.msrb.mxu2 %v1069_v15 }
  0x7c   : > { %366 = vmatpush.msrb.mxu0 %v1075_v16  ;;  %443 = vmatpush.msrb.mxu3 %v1069_v15 }
  0x7d   : > { %392 = vmatpush.msrb.mxu1 %v1075_v16  ;;  %418 = vmatpush.msrb.mxu2 %v1075_v16 }
  0x7e   : > { %444 = vmatpush.msrb.mxu3 %v1075_v16 }
  0xda   : > { %v265_v19 = vpop.f32.mrf.mxu0 }
  0xdb   : > { %v268_v20 = vadd.f32 %v265_v19, %v247_v18 }
  0xdd   : > { %668 = vtanh.f32 %v268_v20 }
  0xe3   : > { %v669_v21 = vpop.eup %668 }
  0xe4   : > { %270 = vst [vmem:[%s987_s1] sm:$0xff] %v669_v21  ;;  %289 = vmatmul.f32.vlgmr.msra.gmra.mxu1 %v669_v21 }
 0x161   : > { %v290_v23 = vpop.f32.mrf.mxu1 }
 0x162   : > { %v293_v24 = vadd.f32 %v576_v22, %v290_v23 }
 0x164   : > { %670 = vtanh.f32 %v293_v24 }
 0x16a   : > { %v671_v25 = vpop.eup %670 }
 0x16b   : > { %577 = vst [vmem:[%s987_s1 + $0x8] sm:$0xff] %v671_v25  ;;  %315 = vmatmul.f32.vlgmr.msra.gmra.mxu2 %v671_v25 }
 0x1ee   : > { %v316_v27 = vpop.f32.mrf.mxu2 }
 0x1ef   : > { %v319_v28 = vadd.f32 %v578_v26, %v316_v27 }
 0x1f1   : > { %672 = vtanh.f32 %v319_v28 }
 0x1f7   : > { %v673_v29 = vpop.eup %672 }
 0x1f8   : > { %579 = vst [vmem:[%s987_s1 + $0x10] sm:$0xff] %v673_v29  ;;  %341 = vmatmul.f32.vlgmr.msra.gmra.mxu3 %v673_v29 }
 0x27b   : > { %v342_v31 = vpop.f32.mrf.mxu3 }
 0x27c   : > { %v345_v32 = vadd.f32 %v580_v30, %v342_v31 }
 0x27e   : > { %674 = vtanh.f32 %v345_v32 }
 0x284   : > { %v675_v33 = vpop.eup %674 }
 0x285   : > { %581 = vst [vmem:[%s987_s1 + $0x18] sm:$0xff] %v675_v33  ;;  %367 = vmatmul.f32.vlgmr.msrb.gmra.mxu0 %v675_v33 }
 0x302   : > { %v368_v35 = vpop.f32.mrf.mxu0 }
 0x303   : > { %v371_v36 = vadd.f32 %v582_v34, %v368_v35 }
 0x305   : > { %676 = vtanh.f32 %v371_v36 }
 0x30b   : > { %v677_v37 = vpop.eup %676 }
 0x30c   : > { %583 = vst [vmem:[%s987_s1 + $0x20] sm:$0xff] %v677_v37  ;;  %393 = vmatmul.f32.vlgmr.msrb.gmra.mxu1 %v677_v37 }
 0x389   : > { %v394_v39 = vpop.f32.mrf.mxu1 }
 0x38a   : > { %v397_v40 = vadd.f32 %v584_v38, %v394_v39 }
 0x38c   : > { %678 = vtanh.f32 %v397_v40 }
 0x392   : > { %v679_v41 = vpop.eup %678 }
 0x393   : > { %585 = vst [vmem:[%s987_s1 + $0x28] sm:$0xff] %v679_v41  ;;  %419 = vmatmul.f32.vlgmr.msrb.gmra.mxu2 %v679_v41 }
 0x416   : > { %v420_v43 = vpop.f32.mrf.mxu2 }
 0x417   : > { %v423_v44 = vadd.f32 %v586_v42, %v420_v43 }
 0x419   : > { %680 = vtanh.f32 %v423_v44 }
 0x41f   : > { %v681_v45 = vpop.eup %680 }
 0x420   : > { %587 = vst [vmem:[%s987_s1 + $0x30] sm:$0xff] %v681_v45  ;;  %445 = vmatmul.f32.vlgmr.msrb.gmra.mxu3 %v681_v45 }
 0x4a3   : > { %v446_v47 = vpop.f32.mrf.mxu3 }
 0x4a4   : > { %v449_v48 = vadd.f32 %v588_v46, %v446_v47 }
 0x4a6   : > { %682 = vtanh.f32 %v449_v48 }
 0x4ac   : > { %v683_v49 = vpop.eup %682 }
 0x4ad   : > { %589 = vst [vmem:[%s987_s1 + $0x38] sm:$0xff] %v683_v49 }
 0x4ae   : > { %453 = vst [vmem:[#allocation2] sm:$0xff] %v683_v49 }
 0x4af   : > { %801 = shalt.err (!%p798_p9)
}
 0x4b0   : > { %s850_s28 = smov 128   ;;  %s851_s27 = smov 8  }
 0x4b1   : > { %607 = dma.vmem_to_hbm [thread:$0]  (%p924_p11), %s468_s17, 1024, %s470_s19, %s455_s29, %s850_s28, %s850_s28, %s851_s27  }
 0x4b2 PF: > { %s484_s11 = sand.u32 1, %s832_s12   ;;  %p1216_p10 = scmp.ge.s32.totalorder %s844_s15, 2 }
 0x4b3   : > { %s485_s20 = scalar_lea.sflag [#allocation5], %s484_s11 }
 0x4b4   : > { %p621_p0 = pnand %p1216_p10, %p928_p12 }
 0x4b6   : > { %p622_p3 = pneg %p621_p0 }
 0x4b8   : > { %827 = dma.done.wait (%p622_p3), %s485_s20, 1024  }
 0x4b9   : > { %829 = vsyncadd (%p622_p3), %s485_s20, 4294966272  ;;  %p17_p7 = scmp.ge.s32.totalorder %s897_s18, 4   ;;  %s1217_s12 = smov %s836_s13 }
 0x4ba   : > { %s1218_s13 = smov %s840_s14  ;;  %s1219_s14 = smov %s909_s21 }
 0x4bb   : > { %s1220_s15 = smov %s897_s18  ;;  %19 = sbr.rel (!%p17_p7) target bundleno = 9 (0x9), region = 103 }
 0x4c0   :  { %491 = vsyncpa [#allocation4], 1 }
 0x4c1   :  { %493 = vsyncpa [#allocation4 + $0x1], 1 }
 0x4c2   :  { %494 = vsyncpa [#allocation7], 1 }
 0x4c3   :  { %495 = vsyncpa [#allocation5], 1 }
 0x4c4   :  { %497 = vsyncpa [#allocation5 + $0x1], 1 }

</bundles_post_ra>
